<compile_context>
chip_gen: v6e
topology: v6e:2x2x1
jax: 0.10.0
libtpu: 0.0.40
codegen_flags: <defaults>
</compile_context>

<pallas_src>
import functools

import jax
import jax.numpy as jnp
from jax.experimental import pallas as pl
from jax.experimental.pallas import tpu as pltpu


def _majority_prob_kernel(idx_ref, x_ref, wt_ref, b_ref, out_ref):
    """softmax(x @ W + b)[:, majority_idx] for one batch tile, computed transposed.

    idx_ref : SMEM scalar-prefetch ref, (1,) int32 -> majority class index
    x_ref   : VMEM, (TB, D)   flattened explicand tile
    wt_ref  : VMEM, (C, D)    eval-head weight, transposed (resident across tiles)
    b_ref   : VMEM, (C, 1)    eval-head bias column (resident across tiles)
    out_ref : VMEM, (1, 1, TB) selected probability per explicand row (lane-dense)
    """
    # logits^T : (C, TB) = W_t (C, D) contracted with x (TB, D) over D
    # (A @ B^T pattern -> native MXU trans_b matmul, no operand relayout).
    logits_t = jax.lax.dot_general(
        wt_ref[...], x_ref[...],
        dimension_numbers=(((1,), (1,)), ((), ())),
        preferred_element_type=jnp.float32,
    )
    logits_t = logits_t + b_ref[...]          # (C, 1) lane-broadcasts over (C, TB)

    # numerically stable exp; class axis is the sublane axis now.
    m = jnp.max(logits_t, axis=0, keepdims=True)       # (1, TB)
    e = jnp.exp(logits_t - m)                           # (C, TB)

    # Select the majority-class row BEFORE normalizing: no full probability
    # tensor is ever materialized.
    cls = idx_ref[0]
    row_ids = jax.lax.broadcasted_iota(jnp.int32, e.shape, dimension=0)
    numer = jnp.sum(jnp.where(row_ids == cls, e, 0.0), axis=0, keepdims=True)  # (1, TB)
    denom = jnp.sum(e, axis=0, keepdims=True)                                  # (1, TB)

    # Approximate reciprocal on the (otherwise idle) EUP slot + one Newton
    # refinement step to keep ~f32 accuracy for the 1e-5 self-test tolerance.
    inv = pl.reciprocal(denom, approx=True)
    inv = inv * (2.0 - denom * inv)

    out_ref[...] = (numer * inv).reshape(out_ref.shape)   # (1, TB) -> (1, 1, TB), free


def prepare_eval_head(weight, bias):
    """One-time parameter layout (init-time, outside the forward hot path):
    weight stored transposed (C, D) for the MXU-native A @ B^T contraction and
    lane-dense class-major logits; bias stored as a (C, 1) column."""
    D, C = weight.shape
    w_t = jnp.transpose(jnp.asarray(weight, jnp.float32))      # (C, D)
    b_col = jnp.asarray(bias, jnp.float32).reshape(C, 1)       # (C, 1)
    return w_t, b_col


def _round_up(x, m):
    return ((x + m - 1) // m) * m


@functools.partial(jax.jit, static_argnames=("max_block_b",))
def corpus_majority_prob_forward(explicand_nchw, wt_f32, bias_col_f32, majority_idx,
                                 *, max_block_b=1024):
    """Pallas-backed equivalent of CorpusMajorityProb.forward.

    explicand_nchw : (B, C, H, W)
    wt_f32         : (NUM_CLASSES, D) float32 (from prepare_eval_head)
    bias_col_f32   : (NUM_CLASSES, 1) float32 (from prepare_eval_head)
    majority_idx   : int32 scalar (corpus majority predicted class)
    returns        : (B,) float32
    """
    B = explicand_nchw.shape[0]
    x = explicand_nchw.reshape(B, -1).astype(jnp.float32)
    C, D = wt_f32.shape

    # Batch tile: multiple of 8 sublanes, capped at max_block_b (<=1024 keeps the
    # double-buffered x tile under every generation's scoped-VMEM default).
    # Split into >=2 blocks when B allows so the "parallel" axis uses both
    # TensorCores on v7x.  No jnp.pad: Pallas masks the partial last block.
    cap = max(8, (max_block_b // 8) * 8)
    tb = min(cap, _round_up(pl.cdiv(B, 2), 8))
    num_blocks = pl.cdiv(B, tb)

    idx = jnp.asarray(majority_idx, dtype=jnp.int32).reshape((1,))

    out = pl.pallas_call(
        _majority_prob_kernel,
        out_shape=jax.ShapeDtypeStruct((num_blocks, 1, tb), jnp.float32),
        grid_spec=pltpu.PrefetchScalarGridSpec(
            num_scalar_prefetch=1,                  # majority class index -> SMEM
            grid=(num_blocks,),                     # tiled over the batch dim
            in_specs=[
                pl.BlockSpec((tb, D), lambda i, idx: (i, 0)),   # explicand tile
                pl.BlockSpec((C, D), lambda i, idx: (0, 0)),    # weight: VMEM-resident
                pl.BlockSpec((C, 1), lambda i, idx: (0, 0)),    # bias:   VMEM-resident
            ],
            out_specs=pl.BlockSpec((1, 1, tb), lambda i, idx: (i, 0, 0)),  # lane-dense row
        ),
        compiler_params=pltpu.CompilerParams(
            # batch axis is embarrassingly parallel -> shards across the 2 TCs on v7x
            dimension_semantics=("parallel",),
            # NOTE: set vmem_limit_bytes here only if max_block_b is raised past 1024.
        ),
    )(idx, x, wt_f32, bias_col_f32)

    # (num_blocks, 1, tb) -> (num_blocks*tb,)[:B]; padded/garbage tail rows discarded.
    return out.reshape(num_blocks * tb)[:B]


def find_corpus_majority_pred(corpus_nchw, weight, bias):
    """Init-time glue (plain JAX): argmax encoder outputs over corpus, then mode."""
    B = corpus_nchw.shape[0]
    C = weight.shape[1]
    logits = corpus_nchw.reshape(B, -1).astype(jnp.float32) @ weight + bias
    pred = jnp.argmax(logits, axis=-1)
    counts = jnp.bincount(pred, length=C)
    # torch .mode() returns the smallest value among ties; jnp.argmax of counts
    # also returns the first (smallest) index among ties.
    return jnp.argmax(counts).astype(jnp.int32)


if __name__ == "__main__":
    key = jax.random.PRNGKey(0)
    k_x, k_corpus, k_w, k_b = jax.random.split(key, 4)

    # small shapes consistent with the module's NCHW encoder input
    B, CH, H, W = 2, 4, 16, 16
    CORPUS_SIZE = 16
    D = CH * H * W
    NUM_CLASSES = 16

    explicand = jax.random.normal(k_x, (B, CH, H, W), dtype=jnp.float32)
    corpus = jax.random.normal(k_corpus, (CORPUS_SIZE, CH, H, W), dtype=jnp.float32)

    # deterministic synthetic eval-head parameters
    weight = jax.random.normal(k_w, (D, NUM_CLASSES), dtype=jnp.float32) * 0.05
    bias = jax.random.normal(k_b, (NUM_CLASSES,), dtype=jnp.float32) * 0.1

    # one-time parameter layout (hoisted out of the forward hot path)
    wt_f32, bias_col_f32 = prepare_eval_head(weight, bias)

    # init-time: corpus majority predicted class
    majority_idx = find_corpus_majority_pred(corpus, weight, bias)

    # forward pass via Pallas kernel
    out = corpus_majority_prob_forward(explicand, wt_f32, bias_col_f32, majority_idx)
    out = jax.block_until_ready(out)

    # reference check in plain JAX
    ref_logits = explicand.reshape(B, -1) @ weight + bias
    ref_probs = jax.nn.softmax(ref_logits, axis=-1)
    ref = ref_probs[:, majority_idx]
    assert out.shape == (B,)
    assert jnp.allclose(out, ref, atol=1e-5, rtol=1e-5)

    print("KERNEL_OK")
</pallas_src>

<mosaic_0001>
module attributes {stable_mosaic.version = 11 : i64} {
  func.func @_majority_prob_kernel(%arg0: i32, %arg1: memref<1xi32, #tpu.memory_space<smem>>, %arg2: memref<8x1024xf32, #tpu.memory_space<vmem>>, %arg3: memref<16x1024xf32, #tpu.memory_space<vmem>>, %arg4: memref<16x1xf32, #tpu.memory_space<vmem>>, %arg5: memref<1x1x8xf32, #tpu.memory_space<vmem>>) attributes {dimension_semantics = [#tpu.dimension_semantics<parallel>], iteration_bounds = array<i64: 1>, scalar_prefetch = 1 : i64, scratch_operands = 0 : i64, tpu.core_type = #tpu.core_type<tc>, window_params = [{transform_indices = @transform_0, window_bounds = array<i64: 8, 1024>}, {pipeline_mode = #tpu.pipeline_mode<synchronous>, transform_indices = @transform_1, window_bounds = array<i64: 16, 1024>}, {pipeline_mode = #tpu.pipeline_mode<synchronous>, transform_indices = @transform_2, window_bounds = array<i64: 16, 1>}, {transform_indices = @transform_3, window_bounds = array<i64: 1, 1, 8>}]} {
    %c0 = arith.constant 0 : index
    %c0_0 = arith.constant 0 : index
    %0 = vector.load %arg3[%c0, %c0_0] : memref<16x1024xf32, #tpu.memory_space<vmem>>, vector<16x1024xf32>
    %c0_1 = arith.constant 0 : index
    %c0_2 = arith.constant 0 : index
    %1 = vector.load %arg2[%c0_1, %c0_2] : memref<8x1024xf32, #tpu.memory_space<vmem>>, vector<8x1024xf32>
    %cst = arith.constant dense<0.000000e+00> : vector<16x8xf32>
    %2 = tpu.matmul %0, %1, %cst {dimension_numbers = #tpu.dot_dimension_numbers<[1], [1], [0], [0], [0, 0, 1, 0], [], []>} : vector<16x1024xf32>, vector<8x1024xf32>, vector<16x8xf32> -> vector<16x8xf32>
    %c0_3 = arith.constant 0 : index
    %c0_4 = arith.constant 0 : index
    %3 = vector.load %arg4[%c0_3, %c0_4] : memref<16x1xf32, #tpu.memory_space<vmem>>, vector<16x1xf32>
    %4 = vector.broadcast %3 : vector<16x1xf32> to vector<16x8xf32>
    %5 = arith.addf %2, %4 : vector<16x8xf32>
    %cst_5 = arith.constant dense<0xFF800000> : vector<8xf32>
    %6 = vector.multi_reduction <maximumf>, %5, %cst_5 [0] : vector<16x8xf32> to vector<8xf32>
    %7 = vector.shape_cast %6 : vector<8xf32> to vector<1x8xf32>
    %8 = vector.broadcast %7 : vector<1x8xf32> to vector<16x8xf32>
    %9 = arith.subf %5, %8 : vector<16x8xf32>
    %10 = math.exp %9 : vector<16x8xf32>
    %c0_6 = arith.constant 0 : index
    %11 = memref.load %arg1[%c0_6] : memref<1xi32, #tpu.memory_space<smem>>
    %12 = tpu.iota {dimensions = array<i32: 0>} : vector<16x8xi32>
    %13 = vector.broadcast %11 : i32 to vector<16x8xi32>
    %14 = arith.cmpi eq, %12, %13 : vector<16x8xi32>
    %cst_7 = arith.constant 0.000000e+00 : f32
    %15 = vector.broadcast %cst_7 : f32 to vector<16x8xf32>
    %16 = arith.select %14, %10, %15 : vector<16x8xi1>, vector<16x8xf32>
    %cst_8 = arith.constant dense<0.000000e+00> : vector<8xf32>
    %17 = vector.multi_reduction <add>, %16, %cst_8 [0] : vector<16x8xf32> to vector<8xf32>
    %18 = vector.shape_cast %17 : vector<8xf32> to vector<1x8xf32>
    %cst_9 = arith.constant dense<0.000000e+00> : vector<8xf32>
    %19 = vector.multi_reduction <add>, %10, %cst_9 [0] : vector<16x8xf32> to vector<8xf32>
    %20 = vector.shape_cast %19 : vector<8xf32> to vector<1x8xf32>
    %21 = tpu.reciprocal %20 {approx = true} : vector<1x8xf32> -> vector<1x8xf32>
    %22 = arith.mulf %20, %21 : vector<1x8xf32>
    %cst_10 = arith.constant 2.000000e+00 : f32
    %23 = vector.broadcast %cst_10 : f32 to vector<1x8xf32>
    %24 = arith.subf %23, %22 : vector<1x8xf32>
    %25 = arith.mulf %21, %24 : vector<1x8xf32>
    %26 = arith.mulf %18, %25 : vector<1x8xf32>
    %27 = vector.shape_cast %26 : vector<1x8xf32> to vector<1x1x8xf32>
    %c0_11 = arith.constant 0 : index
    %c0_12 = arith.constant 0 : index
    %c0_13 = arith.constant 0 : index
    %28 = vector.load %arg5[%c0_11, %c0_12, %c0_13] : memref<1x1x8xf32, #tpu.memory_space<vmem>>, vector<1x1x8xf32>
    tpu.vector_store %arg5[%c0_11, %c0_12, %c0_13], %27 {strides = array<i32>} : memref<1x1x8xf32, #tpu.memory_space<vmem>>, vector<1x1x8xf32>,
    return
  }
  func.func @transform_0(%arg0: i32, %arg1: memref<1xi32, #tpu.memory_space<smem>>) -> (i32, i32) {
    %c0_i32 = arith.constant 0 : i32
    %c0_i32_0 = arith.constant 0 : i32
    return %arg0, %c0_i32 : i32, i32
  }
  func.func @transform_1(%arg0: i32, %arg1: memref<1xi32, #tpu.memory_space<smem>>) -> (i32, i32) {
    %c0_i32 = arith.constant 0 : i32
    %c0_i32_0 = arith.constant 0 : i32
    %c0_i32_1 = arith.constant 0 : i32
    return %c0_i32, %c0_i32_0 : i32, i32
  }
  func.func @transform_2(%arg0: i32, %arg1: memref<1xi32, #tpu.memory_space<smem>>) -> (i32, i32) {
    %c0_i32 = arith.constant 0 : i32
    %c0_i32_0 = arith.constant 0 : i32
    %c0_i32_1 = arith.constant 0 : i32
    return %c0_i32, %c0_i32_0 : i32, i32
  }
  func.func @transform_3(%arg0: i32, %arg1: memref<1xi32, #tpu.memory_space<smem>>) -> (i32, i32, i32) {
    %c0_i32 = arith.constant 0 : i32
    %c0_i32_0 = arith.constant 0 : i32
    %c0_i32_1 = arith.constant 0 : i32
    return %arg0, %c0_i32, %c0_i32_0 : i32, i32, i32
  }
}

</mosaic_0001>

<bundles_post_ra>
// kernel: corpus_majority_prob_forward.1
= control target key start
LH: loop header
LB: loop body
LE: loop exit
PB: predicated region body
PF: predicated region fallthrough
CT: control target
= control target key end

     0   :  { %v67_v0 = vlaneseq  ;;  %v515_v1 = vmov 1983009808   ;;  %v516_v3 = vmov 0   ;;  %vm440_vm0 = vcmask 64512   ;;  %s637_s1 = inlined_call_operand.vmem [shape: f32[2,1024], index: 1, kind: input, shape index: {}]   ;;  %s638_s2 = inlined_call_operand.vmem [shape: f32[16,1024], index: 2, kind: input, shape index: {}]   ;;  %s639_s3 = inlined_call_operand.vmem [shape: f32[16,1], index: 3, kind: input, shape index: {}]   ;;  %s640_s0 = inlined_call_operand.<no memory space> [shape: s32[1], index: 0, kind: input, shape index: {}]   ;;  %s641_s4 = inlined_call_operand.vmem [shape: f32[1,1,8], index: 4, kind: output, shape index: {}]  }
   0x1   :  { %v65_v2 = vunpack.c.l.s4 %v515_v1  ;;  %496 = vset.pattern.permute.xlu0 %v516_v3  ;;  %v497_v4 = vld [vmem:[%s637_s1] ss:$16 sps:$4 sm:$0xff]   ;;  %v501_v8 = vld [vmem:[%s637_s1 + $0x4] ss:$16 sps:$4 sm:$0xff]   ;;  %v17_v10 = vld [vmem:[%s638_s2 + $0x8] sm:$0xff]  ;;  %vm488_vm3 = vcmask 57344  }
   0x2   :  { %v499_v5 = vld [vmem:[%s637_s1 + $0x20] ss:$16 sps:$4 sm:$0xff]   ;;  %v548_v6 = vshrl.u32 %v67_v0, 7  ;;  %v502_v9 = vld [vmem:[%s637_s1 + $0x24] ss:$16 sps:$4 sm:$0xff]   ;;  %204 = vmatprep.mubr.f32.mxu0 %v17_v10  ;;  %v19_v11 = vld [vmem:[%s638_s2 + $0x18] sm:$0xff] }
   0x3   :  { %v66_v7 = vunpack.c.0.s8 %v65_v2  ;;  %279 = vmatprep.mubr.f32.mxu1 %v19_v11  ;;  %v503_v13 = vld [vmem:[%s637_s1 + $0x8] ss:$16 sps:$4 sm:$0xff]   ;;  %v507_v19 = vld [vmem:[%s637_s1 + $0xc] ss:$16 sps:$4 sm:$0xff]   ;;  %v40_v30 = vld [vmem:[%s639_s3] sm:$0xff] }
   0x4   :  { %v505_v14 = vld [vmem:[%s637_s1 + $0x28] ss:$16 sps:$4 sm:$0xff]   ;;  %v508_v20 = vld [vmem:[%s637_s1 + $0x2c] ss:$16 sps:$4 sm:$0xff]   ;;  %v16_v31 = vld [vmem:[%s638_s2] sm:$0xff]  ;;  %44 = vperm.xlu0 %496, %v40_v30  }
   0x5   :  { %v69_v12 = vsub.s32 %v66_v7, %v548_v6  ;;  %v18_v32 = vld [vmem:[%s638_s2 + $0x10] sm:$0xff]  ;;  %v25_v35 = vld [vmem:[%s638_s2 + $0x48] sm:$0xff]  ;;  %v27_v37 = vld [vmem:[%s638_s2 + $0x58] sm:$0xff] }
   0x6   :  { %v41_v38 = vld [vmem:[%s639_s3 + $0x8] sm:$0xff]  ;;  %v24_v39 = vld [vmem:[%s638_s2 + $0x40] sm:$0xff]  ;;  %v26_v40 = vld [vmem:[%s638_s2 + $0x50] sm:$0xff] }
   0x7   :  { %v70_v15 = vrot.slane %v497_v4, %v69_v12  ;;  %v84_v16 = vrot.slane %v499_v5, %v69_v12  ;;  %v77_v17 = vrot.slane %v501_v8, %v69_v12  ;;  %v91_v18 = vrot.slane %v502_v9, %v69_v12  ;;  %v21_v41 = vld [vmem:[%s638_s2 + $0x28] sm:$0xff]  ;;  %v23_v42 = vld [vmem:[%s638_s2 + $0x38] sm:$0xff]  ;;  %v20_v43 = vld [vmem:[%s638_s2 + $0x20] sm:$0xff] }
   0x8   :  { %v106_v21 = vrot.slane %v503_v13, %v69_v12  ;;  %v120_v22 = vrot.slane %v505_v14, %v69_v12  ;;  %v113_v28 = vrot.slane %v507_v19, %v69_v12  ;;  %v127_v29 = vrot.slane %v508_v20, %v69_v12  ;;  %49 = vperm.xlu0 %496, %v41_v38   ;;  %v22_v44 = vld [vmem:[%s638_s2 + $0x30] sm:$0xff]  ;;  %v29_v45 = vld [vmem:[%s638_s2 + $0x68] sm:$0xff]  ;;  %v31_v46 = vld [vmem:[%s638_s2 + $0x78] sm:$0xff] }
   0x9   :  { %v93_v23 = vcombine.high %v70_v15, %v84_v16  ;;  %v92_v24 = vcombine.low %v70_v15, %v84_v16  ;;  %v95_v25 = vcombine.high %v77_v17, %v91_v18  ;;  %v94_v26 = vcombine.low %v77_v17, %v91_v18  ;;  %v28_v47 = vld [vmem:[%s638_s2 + $0x60] sm:$0xff]  ;;  %v30_v48 = vld [vmem:[%s638_s2 + $0x70] sm:$0xff] }
   0xa   :  { %v129_v27 = vcombine.high %v106_v21, %v120_v22  ;;  %v128_v33 = vcombine.low %v106_v21, %v120_v22  ;;  %v131_v34 = vcombine.high %v113_v28, %v127_v29  ;;  %v130_v36 = vcombine.low %v113_v28, %v127_v29 }
   0xb   :  { %170 = vmatprep.subr.mxu0 %v93_v23  ;;  %245 = vmatprep.subr.mxu1 %v95_v25  ;;  %v459_v25 = vadd.s32 8, %v548_v6 }
   0xc   :  { %171 = vmatpush1.xpose.msra.mxu0 %v92_v24  ;;  %246 = vmatpush1.xpose.msra.mxu1 %v94_v26  ;;  %v460_v26 = vstv %s640_s0 }
   0xd   :  { %320 = vmatprep.subr.mxu0 %v129_v27  ;;  %395 = vmatprep.subr.mxu1 %v131_v34  ;;  %vm461_vm1 = vcmp.eq.s32.totalorder %v548_v6, %v460_v26  ;;  %vm462_vm2 = vcmp.eq.s32.totalorder %v459_v25, %v460_v26 }
   0xf   :  { %205 = vmatmul.mubr.f32.vlgmr.msra.gmra.mxu0 %v16_v31  ;;  %280 = vmatmul.mubr.f32.vlgmr.msra.gmra.mxu1 %v18_v32 }
  0x10   :  { %321 = vmatpush1.xpose.msra.mxu0 %v128_v33  ;;  %209 = vmatprep.mubr.f32.mxu0 %v25_v35 }
  0x11   :  { %396 = vmatpush1.xpose.msra.mxu1 %v130_v36  ;;  %284 = vmatprep.mubr.f32.mxu1 %v27_v37 }
  0x13   :  { %210 = vmatmul.mubr.f32.gmra.mxu0 %v24_v39  ;;  %285 = vmatmul.mubr.f32.gmra.mxu1 %v26_v40 }
  0x14   :  { %354 = vmatprep.mubr.f32.mxu0 %v21_v41  ;;  %429 = vmatprep.mubr.f32.mxu1 %v23_v42 }
  0x17   :  { %355 = vmatmul.mubr.f32.vlgmr.msra.gmra.mxu0 %v20_v43  ;;  %430 = vmatmul.mubr.f32.vlgmr.msra.gmra.mxu1 %v22_v44 }
  0x18   :  { %359 = vmatprep.mubr.f32.mxu0 %v29_v45  ;;  %434 = vmatprep.mubr.f32.mxu1 %v31_v46 }
  0x1b   :  { %360 = vmatmul.mubr.f32.gmra.mxu0 %v28_v47  ;;  %435 = vmatmul.mubr.f32.gmra.mxu1 %v30_v48 }
  0x7f   :  { %v45_v49 = vpop.permute.xlu0 %44 }
  0x83   :  { %v50_v55 = vpop.permute.xlu0 %49 }
  0xcf   :  { %v206_v50 = vpop.f32.mrf.mxu0  ;;  %v281_v51 = vpop.f32.mrf.mxu1 }
  0xd0   :  { %v207_v54 = vadd.f32 %v206_v50, %v45_v49 }
  0xd1   :  { %v208_v52 = vpop.f32.mrf.mxu0  ;;  %v283_v53 = vpop.f32.mrf.mxu1 }
  0xd2   :  { %v282_v60 = vadd.f32 %v281_v51, %v207_v54 }
  0xd3   :  { %v211_v56 = vpop.f32.mrf.mxu0  ;;  %v286_v57 = vpop.f32.mrf.mxu1 }
  0xd4   :  { %v212_v61 = vadd.f32 %v211_v56, %v50_v55 }
  0xd5   :  { %v213_v58 = vpop.f32.mrf.mxu0  ;;  %v288_v59 = vpop.f32.mrf.mxu1 }
  0xd6   :  { %v287_v3 = vadd.f32 %v286_v57, %v212_v61 }
  0xd7   :  { %v356_v62 = vpop.f32.mrf.mxu0  ;;  %v431_v63 = vpop.f32.mrf.mxu1 }
  0xd8   :  { %v357_v0 = vadd.f32 %v356_v62, %v282_v60 }
  0xd9   :  { %v358_v1 = vpop.f32.mrf.mxu0  ;;  %v433_v2 = vpop.f32.mrf.mxu1 }
  0xda   :  { %v432_v7 = vadd.f32 %v431_v63, %v357_v0 }
  0xdb   :  { %v361_v4 = vpop.f32.mrf.mxu0  ;;  %v436_v5 = vpop.f32.mrf.mxu1 }
  0xdc   :  { %v362_v8 = vadd.f32 %v361_v4, %v287_v3  ;;  %v441_v12 = vsel %vm440_vm0, %v432_v7, -inf }
  0xdd   :  { %v363_v9 = vpop.f32.mrf.mxu0  ;;  %v438_v10 = vpop.f32.mrf.mxu1 }
  0xde   :  { %v437_v11 = vadd.f32 %v436_v5, %v362_v8 }
  0xe0   :  { %v442_v13 = vsel %vm440_vm0, %v437_v11, -inf }
  0xe1   :  { %v443_v14 = vmax.f32 %v441_v12, %v442_v13 }
  0xe3   :  { %v444_v15 = vrot.slane %v443_v14, 4 }
  0xe5   :  { %v445_v16 = vmax.f32 %v443_v14, %v444_v15 }
  0xe7   :  { %v446_v17 = vrot.slane %v445_v16, 2 }
  0xe9   :  { %v447_v18 = vmax.f32 %v445_v16, %v446_v17 }
  0xeb   :  { %v448_v19 = vrot.slane %v447_v18, 1 }
  0xed   :  { %v449_v20 = vmax.f32 %v447_v18, %v448_v19 }
  0xef   :  { %v450_v21 = vsub.f32 %v432_v7, %v449_v20  ;;  %v451_v22 = vsub.f32 %v437_v11, %v449_v20 }
  0xf1   :  { %v452_v23 = vmul.f32 1.442695, %v450_v21  ;;  %v454_v24 = vmul.f32 1.442695, %v451_v22 }
  0xf3   :  { %509 = vpow2.f32 %v452_v23 }
  0xf4   :  { %511 = vpow2.f32 %v454_v24 }
 0x100   :  { %v510_v27 = vpop.eup %509 }
 0x101   :  { %v512_v28 = vpop.eup %511  ;;  %v474_v29 = vsel %vm440_vm0, %v510_v27, 0.0  ;;  %v463_v32 = vsel %vm461_vm1, %v510_v27, 0.0 }
 0x102   :  { %v475_v30 = vsel %vm440_vm0, %v512_v28, 0.0  ;;  %v464_v33 = vsel %vm462_vm2, %v512_v28, 0.0  ;;  %v465_v36 = vsel %vm440_vm0, %v463_v32, 0.0 }
 0x103   :  { %v476_v31 = vadd.f32 %v475_v30, %v474_v29  ;;  %v466_v37 = vsel %vm440_vm0, %v464_v33, 0.0 }
 0x104   :  { %v467_v39 = vadd.f32 %v466_v37, %v465_v36 }
 0x105   :  { %v477_v34 = vrot.slane %v476_v31, 4 }
 0x106   :  { %v468_v42 = vrot.slane %v467_v39, 4 }
 0x107   :  { %v478_v35 = vadd.f32 %v477_v34, %v476_v31 }
 0x108   :  { %v469_v6 = vadd.f32 %v468_v42, %v467_v39 }
 0x109   :  { %v479_v38 = vrot.slane %v478_v35, 2 }
 0x10a   :  { %v470_v44 = vrot.slane %v469_v6, 2 }
 0x10b   :  { %v480_v40 = vadd.f32 %v479_v38, %v478_v35 }
 0x10c   :  { %v471_v45 = vadd.f32 %v470_v44, %v469_v6 }
 0x10d   :  { %v481_v41 = vrot.slane %v480_v40, 1 }
 0x10e   :  { %v472_v47 = vrot.slane %v471_v45, 1 }
 0x10f   :  { %v482_v43 = vadd.f32 %v481_v41, %v480_v40 }
 0x110   :  { %v473_v50 = vadd.f32 %v472_v47, %v471_v45 }
 0x111   :  { %513 = vrcp.f32 %v482_v43 }
 0x11e   :  { %v514_v46 = vpop.eup %513 }
 0x11f   :  { %v484_v48 = vmul.f32 %v514_v46, %v482_v43 }
 0x121   :  { %v485_v49 = vsub.f32 2.0, %v484_v48 }
 0x123   :  { %v486_v51 = vmul.f32 %v514_v46, %v485_v49 }
 0x125   :  { %v487_v52 = vmul.f32 %v486_v51, %v473_v50 }
 0x127   :  { %489 = vst.msk [vmem:[%s641_s4] sm:$0x1] %vm488_vm3, %v487_v52 }

</bundles_post_ra>
